<compile_context>
chip_gen: v7x
topology: tpu7x:2x2x1
jax: 0.10.0
libtpu: 0.0.40
codegen_flags: <defaults>
</compile_context>

<pallas_src>
import jax
import jax.numpy as jnp
import numpy as np
from jax.experimental import pallas as pl
from jax.experimental.pallas import tpu as pltpu

# Fixed by the PyTorch module definition.
C_IN = 1        # Conv1d in_channels
C_HID = 64      # conv out channels == LSTM input size
H = 32          # LSTM hidden size
G = 4 * H       # 128 = gate width = slab lane width
LEAK = 0.2      # leaky_relu negative slope

# ---- parameter-slab row layout (single (ROWS, 128) f32 VMEM input) ----
ROW_W1 = 0          # conv1 weight as a row        (lanes 0..63, rest 0)
ROW_B1 = 1          # conv1 bias                   (lanes 0..63, rest 0)
ROW_B2 = 2          # conv2 bias                   (lanes 0..63, rest 0)
ROW_BL = 3          # combined LSTM bias, gate order [i | f | o | g]
ROW_WFC = 4         # fc weight row                (lanes 0..31, rest 0)
ROW_BFC = 5         # fc bias broadcast across all 128 lanes
ROW_SCALE = 6       # pre-tanh scale: 0.5 on sigmoid lanes (0..95), 1.0 on g lanes
ROW_HEAD = 8        # head padded to an 8-row tile
ROW_W2T = ROW_HEAD          # 8   .. 135 : conv2 weight^T zero-padded to (128,128)
ROW_WIH = ROW_W2T + G       # 136 .. 263 : LSTM W_ih^T (gate-reordered) padded to (128,128)
ROW_WHH = ROW_WIH + G       # 264 .. 295 : LSTM W_hh^T (gate-reordered) (32,128)
ROWS = ROW_WHH + H          # 296 (multiple of 8)


def _make_kernel(T, N_pad):
    """Builds the fused classifier kernel for static (T, N_pad)."""
    TN = T * N_pad

    def kernel(x_ref, p_ref, out_ref):
        def lrelu(v):
            return jnp.where(v > 0, v, LEAK * v)

        # --- parameter slices (one-time, outside the recurrence) ---
        w1 = p_ref[ROW_W1:ROW_W1 + 1, :]            # (1,128)
        b1 = p_ref[ROW_B1:ROW_B1 + 1, :]            # (1,128)
        b2 = p_ref[ROW_B2:ROW_B2 + 1, :]            # (1,128)
        blstm = p_ref[ROW_BL:ROW_BL + 1, :]         # (1,128)
        scale = p_ref[ROW_SCALE:ROW_SCALE + 1, :]   # (1,128)
        wfc = p_ref[ROW_WFC:ROW_WFC + 1, :H]        # (1,32)
        bfc = p_ref[ROW_BFC:ROW_BFC + 1, 0:1]       # (1,1)
        w2t = p_ref[ROW_W2T:ROW_W2T + G, :]         # (128,128), rows/cols 64+ are 0
        wih_t = p_ref[ROW_WIH:ROW_WIH + G, :]       # (128,128), rows 64+ are 0
        whh_t = p_ref[ROW_WHH:ROW_WHH + H, :]       # (32,128)

        # ---------------- CNN stack (fused over both L positions) ----------------
        # conv1 (k=1, C_in=1) == outer-product broadcast; the two L positions are
        # already stacked along sublanes in x_ref: row = l*TN + t*N_pad + n.
        # Lanes 64..127 stay exactly 0 through the whole conv chain (zero padding).
        h1 = lrelu(x_ref[...] * w1 + b1)                                  # (2*TN, 128)
        # conv2 (k=1) == one matmul covering both positions.
        h2 = lrelu(jnp.dot(h1, w2t, preferred_element_type=jnp.float32) + b2)
        # MaxPool1d(2) over the L == 2 positions == elementwise max of the halves.
        pooled = jnp.maximum(h2[:TN, :], h2[TN:, :])                      # (TN, 128)

        # ------------- LSTM input projection hoisted out of the recurrence -------
        # gx[t*N_pad + n, :] = x_t @ W_ih^T + (b_ih + b_hh), gate cols [i|f|o|g].
        # Kept as a register value (TN x 128 = T*N_pad/8 vregs), no VMEM scratch.
        gx = jnp.dot(pooled, wih_t, preferred_element_type=jnp.float32) + blstm

        # ---------------- LSTM recurrence (1 layer, zero init state) -------------
        h = jnp.zeros((N_pad, H), jnp.float32)
        c = jnp.zeros((N_pad, H), jnp.float32)
        # Fully unrolled; all gx slices are static (one sublane tile each).
        for t in range(T):
            gates = gx[t * N_pad:(t + 1) * N_pad, :] + jnp.dot(
                h, whh_t, preferred_element_type=jnp.float32)            # (N_pad, 128)
            # One EUP tanh over the whole 128-lane vreg:
            #   lanes 0..95  -> tanh(z/2)  (sigmoid gates, scale row = 0.5)
            #   lanes 96..127-> tanh(z)    (cell candidate g, scale row = 1.0)
            act = jnp.tanh(gates * scale)
            sfo = 0.5 * act[:, :3 * H] + 0.5                              # [sig i | sig f | sig o]
            g = act[:, 3 * H:]                                            # tanh g
            c = sfo[:, H:2 * H] * c + sfo[:, :H] * g
            h = sfo[:, 2 * H:3 * H] * jnp.tanh(c)

        # ---------------- fc(32 -> 1) + sigmoid ----------------
        logit = jnp.sum(h * wfc, axis=1, keepdims=True) + bfc             # (N_pad, 1)
        out_ref[...] = 0.5 * jnp.tanh(0.5 * logit) + 0.5                  # sigmoid

    return kernel


def _pack_params(params):
    """Packs all 10 parameter tensors into one (ROWS, 128) f32 slab."""
    w1, b1, w2, b2, wih, whh, bih, bhh, wfc, bfc = params

    # Reorder LSTM gates from torch [i, f, g, o] to [i, f, o, g] so the three
    # sigmoid gates form one contiguous 96-lane block and tanh takes the last 32.
    perm = np.concatenate([np.arange(0, 2 * H),
                           np.arange(3 * H, 4 * H),
                           np.arange(2 * H, 3 * H)])
    wih_r = jnp.asarray(wih, jnp.float32)[perm, :]          # (128, 64)
    whh_r = jnp.asarray(whh, jnp.float32)[perm, :]          # (128, 32)
    b_r = (jnp.asarray(bih, jnp.float32)
           + jnp.asarray(bhh, jnp.float32))[perm]           # (128,)

    head = jnp.zeros((ROW_HEAD, G), jnp.float32)
    head = head.at[ROW_W1, :C_HID].set(jnp.asarray(w1, jnp.float32).reshape(C_HID))
    head = head.at[ROW_B1, :C_HID].set(jnp.asarray(b1, jnp.float32))
    head = head.at[ROW_B2, :C_HID].set(jnp.asarray(b2, jnp.float32))
    head = head.at[ROW_BL, :].set(b_r)
    head = head.at[ROW_WFC, :H].set(jnp.asarray(wfc, jnp.float32).reshape(H))
    head = head.at[ROW_BFC, :].set(jnp.full((G,), jnp.asarray(bfc, jnp.float32)[0]))
    head = head.at[ROW_SCALE, :].set(
        jnp.concatenate([jnp.full((3 * H,), 0.5, jnp.float32),
                         jnp.ones((H,), jnp.float32)]))

    w2t_pad = jnp.zeros((G, G), jnp.float32).at[:C_HID, :C_HID].set(
        jnp.asarray(w2, jnp.float32)[:, :, 0].T)            # (128,128)
    wih_pad = jnp.zeros((G, G), jnp.float32).at[:C_HID, :].set(wih_r.T)  # (128,128)
    whh_t = whh_r.T                                          # (32,128)

    slab = jnp.concatenate([head, w2t_pad, wih_pad, whh_t], axis=0)      # (296,128)
    assert slab.shape == (ROWS, G)
    return slab


def classifier_forward(x, params):
    """x: (N, T, 1, L) float32, torch layout. Returns (N, 1) float32."""
    N, T, C, L = x.shape
    assert C == C_IN
    # MaxPool1d(2) must leave exactly one position so the flattened feature dim is 64.
    assert L == 2, "LSTM input_size=64 requires L == 2"

    # Pad batch to a multiple of 8 so per-timestep gate slices are full sublane tiles.
    N_pad = ((N + 7) // 8) * 8
    xT = jnp.transpose(x[:, :, 0, :].astype(jnp.float32), (1, 0, 2))     # (T, N, L)
    if N_pad != N:
        xT = jnp.pad(xT, ((0, 0), (0, N_pad - N), (0, 0)))
    # Stack the two L positions along sublanes: row = l*T*N_pad + t*N_pad + n.
    x_stacked = jnp.transpose(xT, (2, 0, 1)).reshape(L * T * N_pad, 1)

    slab = _pack_params(params)

    out = pl.pallas_call(
        _make_kernel(T, N_pad),
        out_shape=jax.ShapeDtypeStruct((N_pad, 1), jnp.float32),
        in_specs=[pl.BlockSpec(memory_space=pltpu.MemorySpace.VMEM),
                  pl.BlockSpec(memory_space=pltpu.MemorySpace.VMEM)],
        out_specs=pl.BlockSpec(memory_space=pltpu.MemorySpace.VMEM),
    )(x_stacked, slab)
    return out[:N]


def reference_forward(x, params):
    """Pure-JAX reference matching the PyTorch module exactly."""
    w1, b1, w2, b2, wih, whh, bih, bhh, wfc, bfc = params
    N, T, C, L = x.shape
    lrelu = lambda v: jnp.where(v > 0, v, LEAK * v)

    a = x.reshape(N * T, C, L)
    a = jnp.einsum('oc,bcl->bol', w1[:, :, 0], a) + b1[None, :, None]
    a = lrelu(a)
    a = jnp.einsum('oc,bcl->bol', w2[:, :, 0], a) + b2[None, :, None]
    a = lrelu(a)
    a = a.reshape(N * T, C_HID, L // 2, 2).max(axis=-1)          # MaxPool1d(2)
    a = a.reshape(N, T, C_HID * (L // 2))                        # Flatten(start_dim=2)

    h = jnp.zeros((N, H), jnp.float32)
    c = jnp.zeros((N, H), jnp.float32)
    for t in range(T):
        gates = a[:, t, :] @ wih.T + h @ whh.T + bih + bhh
        i = jax.nn.sigmoid(gates[:, :H])
        f = jax.nn.sigmoid(gates[:, H:2 * H])
        g = jnp.tanh(gates[:, 2 * H:3 * H])
        o = jax.nn.sigmoid(gates[:, 3 * H:])
        c = f * c + i * g
        h = o * jnp.tanh(c)
    return jax.nn.sigmoid(h @ wfc.T + bfc)


if __name__ == "__main__":
    key = jax.random.PRNGKey(0)
    keys = jax.random.split(key, 11)

    # Small shapes implied by the forward: (N, timesteps, C=1, L=2).
    N, T, C, L = 2, 8, 1, 2
    x = jax.random.normal(keys[0], (N, T, C, L), jnp.float32)

    def uinit(k, shape, fan_in):
        bound = 1.0 / np.sqrt(fan_in)
        return jax.random.uniform(k, shape, jnp.float32, -bound, bound)

    params = (
        uinit(keys[1], (C_HID, C_IN, 1), C_IN),       # cnn1.weight (64, 1, 1)
        uinit(keys[2], (C_HID,), C_IN),               # cnn1.bias
        uinit(keys[3], (C_HID, C_HID, 1), C_HID),     # cnn2.weight (64, 64, 1)
        uinit(keys[4], (C_HID,), C_HID),              # cnn2.bias
        uinit(keys[5], (4 * H, C_HID), H),            # lstm.weight_ih_l0 (128, 64)
        uinit(keys[6], (4 * H, H), H),                # lstm.weight_hh_l0 (128, 32)
        uinit(keys[7], (4 * H,), H),                  # lstm.bias_ih_l0
        uinit(keys[8], (4 * H,), H),                  # lstm.bias_hh_l0
        uinit(keys[9], (1, H), H),                    # fc.weight (1, 32)
        uinit(keys[10], (1,), H),                     # fc.bias
    )

    out = classifier_forward(x, params)
    jax.block_until_ready(out)
    assert out.shape == (N, 1)

    ref = reference_forward(x, params)
    np.testing.assert_allclose(np.asarray(out), np.asarray(ref), rtol=1e-4, atol=1e-5)

    print("KERNEL_OK")
</pallas_src>

<mosaic_0001>
module attributes {stable_mosaic.version = 11 : i64} {
  func.func @kernel(%arg0: memref<128x1xf32, #tpu.memory_space<vmem>>, %arg1: memref<296x128xf32, #tpu.memory_space<vmem>>, %arg2: memref<8x1xf32, #tpu.memory_space<vmem>>) attributes {dimension_semantics = [], scalar_prefetch = 0 : i64, scratch_operands = 0 : i64, tpu.core_type = #tpu.core_type<tc>} {
    %c0 = arith.constant 0 : index
    %c0_0 = arith.constant 0 : index
    %0 = vector.load %arg1[%c0, %c0_0] : memref<296x128xf32, #tpu.memory_space<vmem>>, vector<1x128xf32>
    %c1 = arith.constant 1 : index
    %c0_1 = arith.constant 0 : index
    %1 = vector.load %arg1[%c1, %c0_1] : memref<296x128xf32, #tpu.memory_space<vmem>>, vector<1x128xf32>
    %c2 = arith.constant 2 : index
    %c0_2 = arith.constant 0 : index
    %2 = vector.load %arg1[%c2, %c0_2] : memref<296x128xf32, #tpu.memory_space<vmem>>, vector<1x128xf32>
    %c3 = arith.constant 3 : index
    %c0_3 = arith.constant 0 : index
    %3 = vector.load %arg1[%c3, %c0_3] : memref<296x128xf32, #tpu.memory_space<vmem>>, vector<1x128xf32>
    %c6 = arith.constant 6 : index
    %c0_4 = arith.constant 0 : index
    %4 = vector.load %arg1[%c6, %c0_4] : memref<296x128xf32, #tpu.memory_space<vmem>>, vector<1x128xf32>
    %c4 = arith.constant 4 : index
    %c0_5 = arith.constant 0 : index
    %5 = vector.load %arg1[%c4, %c0_5] : memref<296x128xf32, #tpu.memory_space<vmem>>, vector<1x32xf32>
    %c5 = arith.constant 5 : index
    %c0_6 = arith.constant 0 : index
    %6 = vector.load %arg1[%c5, %c0_6] : memref<296x128xf32, #tpu.memory_space<vmem>>, vector<1x1xf32>
    %c8 = arith.constant 8 : index
    %c0_7 = arith.constant 0 : index
    %7 = vector.load %arg1[%c8, %c0_7] : memref<296x128xf32, #tpu.memory_space<vmem>>, vector<128x128xf32>
    %c136 = arith.constant 136 : index
    %c0_8 = arith.constant 0 : index
    %8 = vector.load %arg1[%c136, %c0_8] : memref<296x128xf32, #tpu.memory_space<vmem>>, vector<128x128xf32>
    %c264 = arith.constant 264 : index
    %c0_9 = arith.constant 0 : index
    %9 = vector.load %arg1[%c264, %c0_9] : memref<296x128xf32, #tpu.memory_space<vmem>>, vector<32x128xf32>
    %c0_10 = arith.constant 0 : index
    %c0_11 = arith.constant 0 : index
    %10 = vector.load %arg0[%c0_10, %c0_11] : memref<128x1xf32, #tpu.memory_space<vmem>>, vector<128x1xf32>
    %11 = vector.broadcast %10 : vector<128x1xf32> to vector<128x128xf32>
    %12 = vector.broadcast %0 : vector<1x128xf32> to vector<128x128xf32>
    %13 = arith.mulf %11, %12 : vector<128x128xf32>
    %14 = vector.broadcast %1 : vector<1x128xf32> to vector<128x128xf32>
    %15 = arith.addf %13, %14 : vector<128x128xf32>
    %cst = arith.constant 0.000000e+00 : f32
    %16 = vector.broadcast %cst : f32 to vector<128x128xf32>
    %17 = arith.cmpf ogt, %15, %16 : vector<128x128xf32>
    %cst_12 = arith.constant 2.000000e-01 : f32
    %18 = vector.broadcast %cst_12 : f32 to vector<128x128xf32>
    %19 = arith.mulf %18, %15 : vector<128x128xf32>
    %20 = arith.select %17, %15, %19 : vector<128x128xi1>, vector<128x128xf32>
    %cst_13 = arith.constant dense<0.000000e+00> : vector<128x128xf32>
    %21 = tpu.matmul %20, %7, %cst_13 {dimension_numbers = #tpu.dot_dimension_numbers<[1], [0], [0], [1], [0, 0, 1, 1], [], []>} : vector<128x128xf32>, vector<128x128xf32>, vector<128x128xf32> -> vector<128x128xf32>
    %22 = vector.broadcast %2 : vector<1x128xf32> to vector<128x128xf32>
    %23 = arith.addf %21, %22 : vector<128x128xf32>
    %cst_14 = arith.constant 0.000000e+00 : f32
    %24 = vector.broadcast %cst_14 : f32 to vector<128x128xf32>
    %25 = arith.cmpf ogt, %23, %24 : vector<128x128xf32>
    %cst_15 = arith.constant 2.000000e-01 : f32
    %26 = vector.broadcast %cst_15 : f32 to vector<128x128xf32>
    %27 = arith.mulf %26, %23 : vector<128x128xf32>
    %28 = arith.select %25, %23, %27 : vector<128x128xi1>, vector<128x128xf32>
    %29 = vector.extract_strided_slice %28 {offsets = [0, 0], sizes = [64, 128], strides = [1, 1]} : vector<128x128xf32> to vector<64x128xf32>
    %30 = vector.extract_strided_slice %28 {offsets = [64, 0], sizes = [64, 128], strides = [1, 1]} : vector<128x128xf32> to vector<64x128xf32>
    %31 = arith.maximumf %29, %30 : vector<64x128xf32>
    %cst_16 = arith.constant dense<0.000000e+00> : vector<64x128xf32>
    %32 = tpu.matmul %31, %8, %cst_16 {dimension_numbers = #tpu.dot_dimension_numbers<[1], [0], [0], [1], [0, 0, 1, 1], [], []>} : vector<64x128xf32>, vector<128x128xf32>, vector<64x128xf32> -> vector<64x128xf32>
    %33 = vector.broadcast %3 : vector<1x128xf32> to vector<64x128xf32>
    %34 = arith.addf %32, %33 : vector<64x128xf32>
    %cst_17 = arith.constant 0.000000e+00 : f32
    %35 = vector.broadcast %cst_17 : f32 to vector<8x32xf32>
    %cst_18 = arith.constant 0.000000e+00 : f32
    %36 = vector.broadcast %cst_18 : f32 to vector<8x32xf32>
    %37 = vector.extract_strided_slice %34 {offsets = [0, 0], sizes = [8, 128], strides = [1, 1]} : vector<64x128xf32> to vector<8x128xf32>
    %cst_19 = arith.constant dense<0.000000e+00> : vector<8x128xf32>
    %38 = tpu.matmul %35, %9, %cst_19 {dimension_numbers = #tpu.dot_dimension_numbers<[1], [0], [0], [1], [0, 0, 1, 1], [], []>} : vector<8x32xf32>, vector<32x128xf32>, vector<8x128xf32> -> vector<8x128xf32>
    %39 = arith.addf %37, %38 : vector<8x128xf32>
    %40 = vector.broadcast %4 : vector<1x128xf32> to vector<8x128xf32>
    %41 = arith.mulf %39, %40 : vector<8x128xf32>
    %42 = math.tanh %41 : vector<8x128xf32>
    %43 = vector.extract_strided_slice %42 {offsets = [0, 0], sizes = [8, 96], strides = [1, 1]} : vector<8x128xf32> to vector<8x96xf32>
    %cst_20 = arith.constant 5.000000e-01 : f32
    %44 = vector.broadcast %cst_20 : f32 to vector<8x96xf32>
    %45 = arith.mulf %44, %43 : vector<8x96xf32>
    %cst_21 = arith.constant 5.000000e-01 : f32
    %46 = vector.broadcast %cst_21 : f32 to vector<8x96xf32>
    %47 = arith.addf %45, %46 : vector<8x96xf32>
    %48 = vector.extract_strided_slice %42 {offsets = [0, 96], sizes = [8, 32], strides = [1, 1]} : vector<8x128xf32> to vector<8x32xf32>
    %49 = vector.extract_strided_slice %47 {offsets = [0, 32], sizes = [8, 32], strides = [1, 1]} : vector<8x96xf32> to vector<8x32xf32>
    %50 = arith.mulf %49, %36 : vector<8x32xf32>
    %51 = vector.extract_strided_slice %47 {offsets = [0, 0], sizes = [8, 32], strides = [1, 1]} : vector<8x96xf32> to vector<8x32xf32>
    %52 = arith.mulf %51, %48 : vector<8x32xf32>
    %53 = arith.addf %50, %52 : vector<8x32xf32>
    %54 = vector.extract_strided_slice %47 {offsets = [0, 64], sizes = [8, 32], strides = [1, 1]} : vector<8x96xf32> to vector<8x32xf32>
    %55 = math.tanh %53 : vector<8x32xf32>
    %56 = arith.mulf %54, %55 : vector<8x32xf32>
    %57 = vector.extract_strided_slice %34 {offsets = [8, 0], sizes = [8, 128], strides = [1, 1]} : vector<64x128xf32> to vector<8x128xf32>
    %cst_22 = arith.constant dense<0.000000e+00> : vector<8x128xf32>
    %58 = tpu.matmul %56, %9, %cst_22 {dimension_numbers = #tpu.dot_dimension_numbers<[1], [0], [0], [1], [0, 0, 1, 1], [], []>} : vector<8x32xf32>, vector<32x128xf32>, vector<8x128xf32> -> vector<8x128xf32>
    %59 = arith.addf %57, %58 : vector<8x128xf32>
    %60 = vector.broadcast %4 : vector<1x128xf32> to vector<8x128xf32>
    %61 = arith.mulf %59, %60 : vector<8x128xf32>
    %62 = math.tanh %61 : vector<8x128xf32>
    %63 = vector.extract_strided_slice %62 {offsets = [0, 0], sizes = [8, 96], strides = [1, 1]} : vector<8x128xf32> to vector<8x96xf32>
    %cst_23 = arith.constant 5.000000e-01 : f32
    %64 = vector.broadcast %cst_23 : f32 to vector<8x96xf32>
    %65 = arith.mulf %64, %63 : vector<8x96xf32>
    %cst_24 = arith.constant 5.000000e-01 : f32
    %66 = vector.broadcast %cst_24 : f32 to vector<8x96xf32>
    %67 = arith.addf %65, %66 : vector<8x96xf32>
    %68 = vector.extract_strided_slice %62 {offsets = [0, 96], sizes = [8, 32], strides = [1, 1]} : vector<8x128xf32> to vector<8x32xf32>
    %69 = vector.extract_strided_slice %67 {offsets = [0, 32], sizes = [8, 32], strides = [1, 1]} : vector<8x96xf32> to vector<8x32xf32>
    %70 = arith.mulf %69, %53 : vector<8x32xf32>
    %71 = vector.extract_strided_slice %67 {offsets = [0, 0], sizes = [8, 32], strides = [1, 1]} : vector<8x96xf32> to vector<8x32xf32>
    %72 = arith.mulf %71, %68 : vector<8x32xf32>
    %73 = arith.addf %70, %72 : vector<8x32xf32>
    %74 = vector.extract_strided_slice %67 {offsets = [0, 64], sizes = [8, 32], strides = [1, 1]} : vector<8x96xf32> to vector<8x32xf32>
    %75 = math.tanh %73 : vector<8x32xf32>
    %76 = arith.mulf %74, %75 : vector<8x32xf32>
    %77 = vector.extract_strided_slice %34 {offsets = [16, 0], sizes = [8, 128], strides = [1, 1]} : vector<64x128xf32> to vector<8x128xf32>
    %cst_25 = arith.constant dense<0.000000e+00> : vector<8x128xf32>
    %78 = tpu.matmul %76, %9, %cst_25 {dimension_numbers = #tpu.dot_dimension_numbers<[1], [0], [0], [1], [0, 0, 1, 1], [], []>} : vector<8x32xf32>, vector<32x128xf32>, vector<8x128xf32> -> vector<8x128xf32>
    %79 = arith.addf %77, %78 : vector<8x128xf32>
    %80 = vector.broadcast %4 : vector<1x128xf32> to vector<8x128xf32>
    %81 = arith.mulf %79, %80 : vector<8x128xf32>
    %82 = math.tanh %81 : vector<8x128xf32>
    %83 = vector.extract_strided_slice %82 {offsets = [0, 0], sizes = [8, 96], strides = [1, 1]} : vector<8x128xf32> to vector<8x96xf32>
    %cst_26 = arith.constant 5.000000e-01 : f32
    %84 = vector.broadcast %cst_26 : f32 to vector<8x96xf32>
    %85 = arith.mulf %84, %83 : vector<8x96xf32>
    %cst_27 = arith.constant 5.000000e-01 : f32
    %86 = vector.broadcast %cst_27 : f32 to vector<8x96xf32>
    %87 = arith.addf %85, %86 : vector<8x96xf32>
    %88 = vector.extract_strided_slice %82 {offsets = [0, 96], sizes = [8, 32], strides = [1, 1]} : vector<8x128xf32> to vector<8x32xf32>
    %89 = vector.extract_strided_slice %87 {offsets = [0, 32], sizes = [8, 32], strides = [1, 1]} : vector<8x96xf32> to vector<8x32xf32>
    %90 = arith.mulf %89, %73 : vector<8x32xf32>
    %91 = vector.extract_strided_slice %87 {offsets = [0, 0], sizes = [8, 32], strides = [1, 1]} : vector<8x96xf32> to vector<8x32xf32>
    %92 = arith.mulf %91, %88 : vector<8x32xf32>
    %93 = arith.addf %90, %92 : vector<8x32xf32>
    %94 = vector.extract_strided_slice %87 {offsets = [0, 64], sizes = [8, 32], strides = [1, 1]} : vector<8x96xf32> to vector<8x32xf32>
    %95 = math.tanh %93 : vector<8x32xf32>
    %96 = arith.mulf %94, %95 : vector<8x32xf32>
    %97 = vector.extract_strided_slice %34 {offsets = [24, 0], sizes = [8, 128], strides = [1, 1]} : vector<64x128xf32> to vector<8x128xf32>
    %cst_28 = arith.constant dense<0.000000e+00> : vector<8x128xf32>
    %98 = tpu.matmul %96, %9, %cst_28 {dimension_numbers = #tpu.dot_dimension_numbers<[1], [0], [0], [1], [0, 0, 1, 1], [], []>} : vector<8x32xf32>, vector<32x128xf32>, vector<8x128xf32> -> vector<8x128xf32>
    %99 = arith.addf %97, %98 : vector<8x128xf32>
    %100 = vector.broadcast %4 : vector<1x128xf32> to vector<8x128xf32>
    %101 = arith.mulf %99, %100 : vector<8x128xf32>
    %102 = math.tanh %101 : vector<8x128xf32>
    %103 = vector.extract_strided_slice %102 {offsets = [0, 0], sizes = [8, 96], strides = [1, 1]} : vector<8x128xf32> to vector<8x96xf32>
    %cst_29 = arith.constant 5.000000e-01 : f32
    %104 = vector.broadcast %cst_29 : f32 to vector<8x96xf32>
    %105 = arith.mulf %104, %103 : vector<8x96xf32>
    %cst_30 = arith.constant 5.000000e-01 : f32
    %106 = vector.broadcast %cst_30 : f32 to vector<8x96xf32>
    %107 = arith.addf %105, %106 : vector<8x96xf32>
    %108 = vector.extract_strided_slice %102 {offsets = [0, 96], sizes = [8, 32], strides = [1, 1]} : vector<8x128xf32> to vector<8x32xf32>
    %109 = vector.extract_strided_slice %107 {offsets = [0, 32], sizes = [8, 32], strides = [1, 1]} : vector<8x96xf32> to vector<8x32xf32>
    %110 = arith.mulf %109, %93 : vector<8x32xf32>
    %111 = vector.extract_strided_slice %107 {offsets = [0, 0], sizes = [8, 32], strides = [1, 1]} : vector<8x96xf32> to vector<8x32xf32>
    %112 = arith.mulf %111, %108 : vector<8x32xf32>
    %113 = arith.addf %110, %112 : vector<8x32xf32>
    %114 = vector.extract_strided_slice %107 {offsets = [0, 64], sizes = [8, 32], strides = [1, 1]} : vector<8x96xf32> to vector<8x32xf32>
    %115 = math.tanh %113 : vector<8x32xf32>
    %116 = arith.mulf %114, %115 : vector<8x32xf32>
    %117 = vector.extract_strided_slice %34 {offsets = [32, 0], sizes = [8, 128], strides = [1, 1]} : vector<64x128xf32> to vector<8x128xf32>
    %cst_31 = arith.constant dense<0.000000e+00> : vector<8x128xf32>
    %118 = tpu.matmul %116, %9, %cst_31 {dimension_numbers = #tpu.dot_dimension_numbers<[1], [0], [0], [1], [0, 0, 1, 1], [], []>} : vector<8x32xf32>, vector<32x128xf32>, vector<8x128xf32> -> vector<8x128xf32>
    %119 = arith.addf %117, %118 : vector<8x128xf32>
    %120 = vector.broadcast %4 : vector<1x128xf32> to vector<8x128xf32>
    %121 = arith.mulf %119, %120 : vector<8x128xf32>
    %122 = math.tanh %121 : vector<8x128xf32>
    %123 = vector.extract_strided_slice %122 {offsets = [0, 0], sizes = [8, 96], strides = [1, 1]} : vector<8x128xf32> to vector<8x96xf32>
    %cst_32 = arith.constant 5.000000e-01 : f32
    %124 = vector.broadcast %cst_32 : f32 to vector<8x96xf32>
    %125 = arith.mulf %124, %123 : vector<8x96xf32>
    %cst_33 = arith.constant 5.000000e-01 : f32
    %126 = vector.broadcast %cst_33 : f32 to vector<8x96xf32>
    %127 = arith.addf %125, %126 : vector<8x96xf32>
    %128 = vector.extract_strided_slice %122 {offsets = [0, 96], sizes = [8, 32], strides = [1, 1]} : vector<8x128xf32> to vector<8x32xf32>
    %129 = vector.extract_strided_slice %127 {offsets = [0, 32], sizes = [8, 32], strides = [1, 1]} : vector<8x96xf32> to vector<8x32xf32>
    %130 = arith.mulf %129, %113 : vector<8x32xf32>
    %131 = vector.extract_strided_slice %127 {offsets = [0, 0], sizes = [8, 32], strides = [1, 1]} : vector<8x96xf32> to vector<8x32xf32>
    %132 = arith.mulf %131, %128 : vector<8x32xf32>
    %133 = arith.addf %130, %132 : vector<8x32xf32>
    %134 = vector.extract_strided_slice %127 {offsets = [0, 64], sizes = [8, 32], strides = [1, 1]} : vector<8x96xf32> to vector<8x32xf32>
    %135 = math.tanh %133 : vector<8x32xf32>
    %136 = arith.mulf %134, %135 : vector<8x32xf32>
    %137 = vector.extract_strided_slice %34 {offsets = [40, 0], sizes = [8, 128], strides = [1, 1]} : vector<64x128xf32> to vector<8x128xf32>
    %cst_34 = arith.constant dense<0.000000e+00> : vector<8x128xf32>
    %138 = tpu.matmul %136, %9, %cst_34 {dimension_numbers = #tpu.dot_dimension_numbers<[1], [0], [0], [1], [0, 0, 1, 1], [], []>} : vector<8x32xf32>, vector<32x128xf32>, vector<8x128xf32> -> vector<8x128xf32>
    %139 = arith.addf %137, %138 : vector<8x128xf32>
    %140 = vector.broadcast %4 : vector<1x128xf32> to vector<8x128xf32>
    %141 = arith.mulf %139, %140 : vector<8x128xf32>
    %142 = math.tanh %141 : vector<8x128xf32>
    %143 = vector.extract_strided_slice %142 {offsets = [0, 0], sizes = [8, 96], strides = [1, 1]} : vector<8x128xf32> to vector<8x96xf32>
    %cst_35 = arith.constant 5.000000e-01 : f32
    %144 = vector.broadcast %cst_35 : f32 to vector<8x96xf32>
    %145 = arith.mulf %144, %143 : vector<8x96xf32>
    %cst_36 = arith.constant 5.000000e-01 : f32
    %146 = vector.broadcast %cst_36 : f32 to vector<8x96xf32>
    %147 = arith.addf %145, %146 : vector<8x96xf32>
    %148 = vector.extract_strided_slice %142 {offsets = [0, 96], sizes = [8, 32], strides = [1, 1]} : vector<8x128xf32> to vector<8x32xf32>
    %149 = vector.extract_strided_slice %147 {offsets = [0, 32], sizes = [8, 32], strides = [1, 1]} : vector<8x96xf32> to vector<8x32xf32>
    %150 = arith.mulf %149, %133 : vector<8x32xf32>
    %151 = vector.extract_strided_slice %147 {offsets = [0, 0], sizes = [8, 32], strides = [1, 1]} : vector<8x96xf32> to vector<8x32xf32>
    %152 = arith.mulf %151, %148 : vector<8x32xf32>
    %153 = arith.addf %150, %152 : vector<8x32xf32>
    %154 = vector.extract_strided_slice %147 {offsets = [0, 64], sizes = [8, 32], strides = [1, 1]} : vector<8x96xf32> to vector<8x32xf32>
    %155 = math.tanh %153 : vector<8x32xf32>
    %156 = arith.mulf %154, %155 : vector<8x32xf32>
    %157 = vector.extract_strided_slice %34 {offsets = [48, 0], sizes = [8, 128], strides = [1, 1]} : vector<64x128xf32> to vector<8x128xf32>
    %cst_37 = arith.constant dense<0.000000e+00> : vector<8x128xf32>
    %158 = tpu.matmul %156, %9, %cst_37 {dimension_numbers = #tpu.dot_dimension_numbers<[1], [0], [0], [1], [0, 0, 1, 1], [], []>} : vector<8x32xf32>, vector<32x128xf32>, vector<8x128xf32> -> vector<8x128xf32>
    %159 = arith.addf %157, %158 : vector<8x128xf32>
    %160 = vector.broadcast %4 : vector<1x128xf32> to vector<8x128xf32>
    %161 = arith.mulf %159, %160 : vector<8x128xf32>
    %162 = math.tanh %161 : vector<8x128xf32>
    %163 = vector.extract_strided_slice %162 {offsets = [0, 0], sizes = [8, 96], strides = [1, 1]} : vector<8x128xf32> to vector<8x96xf32>
    %cst_38 = arith.constant 5.000000e-01 : f32
    %164 = vector.broadcast %cst_38 : f32 to vector<8x96xf32>
    %165 = arith.mulf %164, %163 : vector<8x96xf32>
    %cst_39 = arith.constant 5.000000e-01 : f32
    %166 = vector.broadcast %cst_39 : f32 to vector<8x96xf32>
    %167 = arith.addf %165, %166 : vector<8x96xf32>
    %168 = vector.extract_strided_slice %162 {offsets = [0, 96], sizes = [8, 32], strides = [1, 1]} : vector<8x128xf32> to vector<8x32xf32>
    %169 = vector.extract_strided_slice %167 {offsets = [0, 32], sizes = [8, 32], strides = [1, 1]} : vector<8x96xf32> to vector<8x32xf32>
    %170 = arith.mulf %169, %153 : vector<8x32xf32>
    %171 = vector.extract_strided_slice %167 {offsets = [0, 0], sizes = [8, 32], strides = [1, 1]} : vector<8x96xf32> to vector<8x32xf32>
    %172 = arith.mulf %171, %168 : vector<8x32xf32>
    %173 = arith.addf %170, %172 : vector<8x32xf32>
    %174 = vector.extract_strided_slice %167 {offsets = [0, 64], sizes = [8, 32], strides = [1, 1]} : vector<8x96xf32> to vector<8x32xf32>
    %175 = math.tanh %173 : vector<8x32xf32>
    %176 = arith.mulf %174, %175 : vector<8x32xf32>
    %177 = vector.extract_strided_slice %34 {offsets = [56, 0], sizes = [8, 128], strides = [1, 1]} : vector<64x128xf32> to vector<8x128xf32>
    %cst_40 = arith.constant dense<0.000000e+00> : vector<8x128xf32>
    %178 = tpu.matmul %176, %9, %cst_40 {dimension_numbers = #tpu.dot_dimension_numbers<[1], [0], [0], [1], [0, 0, 1, 1], [], []>} : vector<8x32xf32>, vector<32x128xf32>, vector<8x128xf32> -> vector<8x128xf32>
    %179 = arith.addf %177, %178 : vector<8x128xf32>
    %180 = vector.broadcast %4 : vector<1x128xf32> to vector<8x128xf32>
    %181 = arith.mulf %179, %180 : vector<8x128xf32>
    %182 = math.tanh %181 : vector<8x128xf32>
    %183 = vector.extract_strided_slice %182 {offsets = [0, 0], sizes = [8, 96], strides = [1, 1]} : vector<8x128xf32> to vector<8x96xf32>
    %cst_41 = arith.constant 5.000000e-01 : f32
    %184 = vector.broadcast %cst_41 : f32 to vector<8x96xf32>
    %185 = arith.mulf %184, %183 : vector<8x96xf32>
    %cst_42 = arith.constant 5.000000e-01 : f32
    %186 = vector.broadcast %cst_42 : f32 to vector<8x96xf32>
    %187 = arith.addf %185, %186 : vector<8x96xf32>
    %188 = vector.extract_strided_slice %182 {offsets = [0, 96], sizes = [8, 32], strides = [1, 1]} : vector<8x128xf32> to vector<8x32xf32>
    %189 = vector.extract_strided_slice %187 {offsets = [0, 32], sizes = [8, 32], strides = [1, 1]} : vector<8x96xf32> to vector<8x32xf32>
    %190 = arith.mulf %189, %173 : vector<8x32xf32>
    %191 = vector.extract_strided_slice %187 {offsets = [0, 0], sizes = [8, 32], strides = [1, 1]} : vector<8x96xf32> to vector<8x32xf32>
    %192 = arith.mulf %191, %188 : vector<8x32xf32>
    %193 = arith.addf %190, %192 : vector<8x32xf32>
    %194 = vector.extract_strided_slice %187 {offsets = [0, 64], sizes = [8, 32], strides = [1, 1]} : vector<8x96xf32> to vector<8x32xf32>
    %195 = math.tanh %193 : vector<8x32xf32>
    %196 = arith.mulf %194, %195 : vector<8x32xf32>
    %197 = vector.broadcast %5 : vector<1x32xf32> to vector<8x32xf32>
    %198 = arith.mulf %196, %197 : vector<8x32xf32>
    %cst_43 = arith.constant dense<0.000000e+00> : vector<8xf32>
    %199 = vector.multi_reduction <add>, %198, %cst_43 [1] : vector<8x32xf32> to vector<8xf32>
    %200 = vector.shape_cast %199 : vector<8xf32> to vector<8x1xf32>
    %201 = vector.broadcast %6 : vector<1x1xf32> to vector<8x1xf32>
    %202 = arith.addf %200, %201 : vector<8x1xf32>
    %cst_44 = arith.constant 5.000000e-01 : f32
    %203 = vector.broadcast %cst_44 : f32 to vector<8x1xf32>
    %204 = arith.mulf %203, %202 : vector<8x1xf32>
    %205 = math.tanh %204 : vector<8x1xf32>
    %cst_45 = arith.constant 5.000000e-01 : f32
    %206 = vector.broadcast %cst_45 : f32 to vector<8x1xf32>
    %207 = arith.mulf %206, %205 : vector<8x1xf32>
    %cst_46 = arith.constant 5.000000e-01 : f32
    %208 = vector.broadcast %cst_46 : f32 to vector<8x1xf32>
    %209 = arith.addf %207, %208 : vector<8x1xf32>
    %c0_47 = arith.constant 0 : index
    %c0_48 = arith.constant 0 : index
    %210 = vector.load %arg2[%c0_47, %c0_48] : memref<8x1xf32, #tpu.memory_space<vmem>>, vector<8x1xf32>
    tpu.vector_store %arg2[%c0_47, %c0_48], %209 {strides = array<i32>} : memref<8x1xf32, #tpu.memory_space<vmem>>, vector<8x1xf32>,
    return
  }
}

</mosaic_0001>

<bundles_post_ra>
// kernel: tpu_custom_call.1
= control target key start
LH: loop header
LB: loop body
LE: loop exit
PB: predicated region body
PF: predicated region fallthrough
CT: control target
= control target key end

     0   :  { %7 = vsyncpa [#allocation3], 0  ;;  %s1856_s9 = smov [#allocation2]   ;;  %s2124_s0 = inlined_call_operand.vmem [shape: f32[128,1], index: 0, kind: input, shape index: {}]   ;;  %s2125_s1 = inlined_call_operand.hbm [shape: f32[296,128], index: 1, kind: input, shape index: {}]   ;;  %s2126_s2 = inlined_call_operand.vmem [shape: f32[8,1], index: 2, kind: output, shape index: {}]  }
   0x1   :  { %s15_s10 = sshll.u32 %s1856_s9, 4  ;;  %s1832_s13 = scalar_lea.hbm %s2125_s1, 4736  ;;  %s16_s10 = int_to_ptr.vmem [resolvable:$true] %s15_s10 }
   0x2   :  { %p1833_p0 = scmp.ne.s32.totalorder %s2125_s1, %s1832_s13  ;;  %p1836_p1 = scmp.lt.u32.totalorder %s1832_s13, %s2125_s1 }
   0x4   :  { %p1838_p2 = pnand %p1836_p1, %p1833_p0 }
   0x6   :  { %1841 = shalt.err (!%p1838_p2)
}
   0x7   :  { %s1842_s18 = scalar_lea.vmem %s16_s10, 4736  ;;  %p1847_p4 = scmp.lt.s32.totalorder %s16_s10, %s16_s10 }
   0x8   :  { %p1843_p3 = scmp.ne.s32.totalorder %s16_s10, %s1842_s18  ;;  %p1848_p5 = scmp.lt.s32.totalorder %s1842_s18, %s1842_s18 }
   0xa   :  { %p1849_p6 = por %p1848_p5, %p1847_p4 }
   0xc   :  { %p1850_p7 = pnand %p1849_p6, %p1843_p3 }
   0xe   :  { %1853 = shalt.err (!%p1850_p7)
}
   0xf   :  { %s1857_s19 = smov 128   ;;  %s1858_s20 = smov 8  }
  0x10   :  { %21 = dma.hbm_to_vmem [thread:$0]  %s2125_s1, 4736, %s16_s10, [#allocation3], %s1857_s19, %s1857_s19, %s1858_s20  }
  0x11   :  { %1854 = dma.done.wait [#allocation3], 4736  }
  0x12   :  { %1855 = vsyncadd [#allocation3], 4294962560  ;;  %v1859_v0 = vmov 0   ;;  %v70_v1 = vld [vmem:[%s2124_s0 + $0x10] sm:$0xff]  ;;  %v68_v2 = vld [vmem:[%s2124_s0] sm:$0xff]  ;;  %s1864_s26 = smov 64  }
  0x13   :  { %1797 = vset.pattern.permute.xlu1 %v1859_v0  ;;  %1796 = vset.pattern.permute.xlu0 %v1859_v0  ;;  %v71_v3 = vld [vmem:[%s2124_s0 + $0x18] sm:$0xff]  ;;  %v69_v4 = vld [vmem:[%s2124_s0 + $0x8] sm:$0xff]  ;;  %v33_v7 = vld [vmem:[#allocation2 + $0x10] sm:$0xff] }
  0x14   :  { %96 = vperm.xlu1 %1797, %v70_v1   ;;  %86 = vperm.xlu0 %1796, %v68_v2   ;;  %v73_v5 = vld [vmem:[%s2124_s0 + $0x28] sm:$0xff]  ;;  %v72_v8 = vld [vmem:[%s2124_s0 + $0x20] sm:$0xff]  ;;  %v34_v10 = vld [vmem:[#allocation2 + $0x18] sm:$0xff] }
  0x15   :  { %v32_v6 = vld [vmem:[#allocation2 + $0x8] sm:$0xff]  ;;  %v35_v11 = vld [vmem:[#allocation2 + $0x20] sm:$0xff]  ;;  %v37_v14 = vld [vmem:[#allocation2 + $0x30] sm:$0xff] }
  0x16   :  { %v1675_v9 = vpack.c.bf16 %v33_v7, %v32_v6  ;;  %v1679_v12 = vpack.c.bf16 %v35_v11, %v34_v10  ;;  %v36_v13 = vld [vmem:[#allocation2 + $0x28] sm:$0xff]  ;;  %v75_v15 = vld [vmem:[%s2124_s0 + $0x38] sm:$0xff]  ;;  %v74_v16 = vld [vmem:[%s2124_s0 + $0x30] sm:$0xff] }
  0x17   :  { %v1683_v17 = vpack.c.bf16 %v37_v14, %v36_v13  ;;  %v38_v18 = vld [vmem:[#allocation2 + $0x38] sm:$0xff]  ;;  %v39_v19 = vld [vmem:[#allocation2 + $0x40] sm:$0xff]  ;;  %v77_v20 = vld [vmem:[%s2124_s0 + $0x48] sm:$0xff] }
  0x18   :  { %101 = vperm.xlu1 %1797, %v71_v3   ;;  %91 = vperm.xlu0 %1796, %v69_v4   ;;  %v76_v21 = vld [vmem:[%s2124_s0 + $0x40] sm:$0xff]  ;;  %v1687_v22 = vpack.c.bf16 %v39_v19, %v38_v18  ;;  %v40_v23 = vld [vmem:[#allocation2 + $0x48] sm:$0xff]  ;;  %v41_v24 = vld [vmem:[#allocation2 + $0x50] sm:$0xff] }
  0x19   :  { %1676 = vmatprep.subr.bf16.mxu0 %v1675_v9  ;;  %v79_v25 = vld [vmem:[%s2124_s0 + $0x58] sm:$0xff]  ;;  %v78_v26 = vld [vmem:[%s2124_s0 + $0x50] sm:$0xff]  ;;  %v1691_v27 = vpack.c.bf16 %v41_v24, %v40_v23  ;;  %v43_v29 = vld [vmem:[#allocation2 + $0x60] sm:$0xff] }
  0x1a   :  { %1678 = vmatpush3.bf16.msra.mxu0 %v1675_v9  ;;  %v42_v28 = vld [vmem:[#allocation2 + $0x58] sm:$0xff]  ;;  %v81_v30 = vld [vmem:[%s2124_s0 + $0x68] sm:$0xff]  ;;  %v80_v31 = vld [vmem:[%s2124_s0 + $0x60] sm:$0xff] }
  0x1b   :  { %1680 = vmatprep.subr.bf16.mxu0 %v1679_v12  ;;  %v1695_v32 = vpack.c.bf16 %v43_v29, %v42_v28  ;;  %v44_v33 = vld [vmem:[#allocation2 + $0x68] sm:$0xff]  ;;  %v45_v34 = vld [vmem:[#allocation2 + $0x70] sm:$0xff]  ;;  %v83_v35 = vld [vmem:[%s2124_s0 + $0x78] sm:$0xff] }
  0x1c   :  { %111 = vperm.xlu1 %1797, %v73_v5   ;;  %106 = vperm.xlu0 %1796, %v72_v8   ;;  %v82_v36 = vld [vmem:[%s2124_s0 + $0x70] sm:$0xff]  ;;  %v1699_v37 = vpack.c.bf16 %v45_v34, %v44_v33  ;;  %v46_v38 = vld [vmem:[#allocation2 + $0x78] sm:$0xff]  ;;  %v47_v39 = vld [vmem:[#allocation2 + $0x80] sm:$0xff]  ;;  %s1863_s0 = smov 32  }
  0x1d   :  { %v1703_v40 = vpack.c.bf16 %v47_v39, %v46_v38  ;;  %v48_v41 = vld [vmem:[#allocation2 + $0x88] sm:$0xff]  ;;  %v49_v42 = vld [vmem:[#allocation2 + $0x90] sm:$0xff]  ;;  %v50_v43 = vld [vmem:[#allocation2 + $0x98] sm:$0xff] }
  0x1e   :  { %1682 = vmatpush3.bf16.msra.mxu0 %v1679_v12  ;;  %v1707_v44 = vpack.c.bf16 %v49_v42, %v48_v41  ;;  %v51_v45 = vld [vmem:[#allocation2 + $0xa0] sm:$0xff] }
  0x1f   :  { %1684 = vmatprep.subr.bf16.mxu0 %v1683_v17  ;;  %v1711_v46 = vpack.c.bf16 %v51_v45, %v50_v43  ;;  %v1940_v47 = vld [vmem:[#allocation2] ss:$0 sm:$0xff]  ;;  %v1942_v49 = vld [vmem:[#allocation2 + $0x1] ss:$0 sm:$0xff] }
  0x20   :  { %121 = vperm.xlu1 %1797, %v75_v15   ;;  %116 = vperm.xlu0 %1796, %v74_v16  }
  0x21   :  { %1708 = vmatprep.subr.bf16.mxu1 %v1707_v44 }
  0x22   :  { %1686 = vmatpush3.bf16.msra.mxu0 %v1683_v17  ;;  %1710 = vmatpush3.bf16.msra.mxu1 %v1707_v44 }
  0x23   :  { %1688 = vmatprep.subr.bf16.mxu0 %v1687_v22  ;;  %1712 = vmatprep.subr.bf16.mxu1 %v1711_v46 }
  0x24   :  { %131 = vperm.xlu1 %1797, %v77_v20   ;;  %126 = vperm.xlu0 %1796, %v76_v21  }
  0x26   :  { %1690 = vmatpush3.bf16.msra.mxu0 %v1687_v22  ;;  %1714 = vmatpush3.bf16.msra.mxu1 %v1711_v46 }
  0x27   :  { %1692 = vmatprep.subr.bf16.mxu0 %v1691_v27 }
  0x28   :  { %141 = vperm.xlu1 %1797, %v79_v25   ;;  %136 = vperm.xlu0 %1796, %v78_v26  }
  0x2a   :  { %1694 = vmatpush3.bf16.msra.mxu0 %v1691_v27 }
  0x2b   :  { %1696 = vmatprep.subr.bf16.mxu0 %v1695_v32 }
  0x2c   :  { %151 = vperm.xlu1 %1797, %v81_v30   ;;  %146 = vperm.xlu0 %1796, %v80_v31  }
  0x2e   :  { %1698 = vmatpush3.bf16.msra.mxu0 %v1695_v32 }
  0x2f   :  { %1700 = vmatprep.subr.bf16.mxu0 %v1699_v37 }
  0x30   :  { %161 = vperm.xlu1 %1797, %v83_v35   ;;  %156 = vperm.xlu0 %1796, %v82_v36  }
  0x32   :  { %1702 = vmatpush3.bf16.msra.mxu0 %v1699_v37 }
  0x33   :  { %1704 = vmatprep.subr.bf16.mxu0 %v1703_v40 }
  0x36   :  { %1706 = vmatpush3.bf16.msra.mxu0 %v1703_v40 }
  0x93   :  { %v97_v48 = vpop.permute.xlu1 %96  ;;  %v87_v50 = vpop.permute.xlu0 %86 }
  0x94   :  { %v170_v51 = vmul.f32 %v1940_v47, %v97_v48  ;;  %v168_v52 = vmul.f32 %v1940_v47, %v87_v50 }
  0x96   :  { %v188_v53 = vadd.f32 %v1942_v49, %v168_v52  ;;  %v190_v54 = vadd.f32 %v1942_v49, %v170_v51 }
  0x97   :  { %v102_v55 = vpop.permute.xlu1 %101  ;;  %v92_v56 = vpop.permute.xlu0 %91 }
  0x98   :  { %v171_v57 = vmul.f32 %v1940_v47, %v102_v55  ;;  %v169_v58 = vmul.f32 %v1940_v47, %v92_v56  ;;  %vm204_vm0 = vcmp.gt.f32.partialorder %v188_v53, 0.0  ;;  %v220_v59 = vmul.f32 0.2, %v188_v53 }
  0x99   :  { %vm206_vm1 = vcmp.gt.f32.partialorder %v190_v54, 0.0  ;;  %v222_v1 = vmul.f32 0.2, %v190_v54 }
  0x9a   :  { %v191_v60 = vadd.f32 %v1942_v49, %v171_v57  ;;  %v189_v61 = vadd.f32 %v1942_v49, %v169_v58  ;;  %v236_v62 = vsel %vm204_vm0, %v188_v53, %v220_v59  ;;  %vm1861_vm0 = vmmov 0  }
  0x9b   :  { %v112_v63 = vpop.permute.xlu1 %111  ;;  %v107_v0 = vpop.permute.xlu0 %106  ;;  %1519 = vmatprep.mubr.f32.mxu0 %v236_v62  ;;  %v238_v11 = vsel %vm206_vm1, %v190_v54, %v222_v1 }
  0x9c   :  { %v173_v2 = vmul.f32 %v1940_v47, %v112_v63  ;;  %v172_v3 = vmul.f32 %v1940_v47, %v107_v0  ;;  %vm205_vm2 = vcmp.gt.f32.partialorder %v189_v61, 0.0  ;;  %v221_v4 = vmul.f32 0.2, %v189_v61 }
  0x9d   :  { %v223_v5 = vmul.f32 0.2, %v191_v60  ;;  %vm207_vm3 = vcmp.gt.f32.partialorder %v191_v60, 0.0 }
  0x9e   :  { %v193_v6 = vadd.f32 %v1942_v49, %v173_v2  ;;  %v192_v7 = vadd.f32 %v1942_v49, %v172_v3  ;;  %v237_v8 = vsel %vm205_vm2, %v189_v61, %v221_v4  ;;  %v52_v2 = vld [vmem:[#allocation2 + $0xa8] sm:$0xff]  ;;  %v53_v3 = vld [vmem:[#allocation2 + $0xb0] sm:$0xff] }
  0x9f   :  { %v122_v9 = vpop.permute.xlu1 %121  ;;  %v117_v10 = vpop.permute.xlu0 %116  ;;  %1520 = vmatmul.mubr.f32.vlgmr.msra.gmra.mrb[0].mxu0 %v237_v8  ;;  %v239_v15 = vsel %vm207_vm3, %v191_v60, %v223_v5  ;;  %v1715_v4 = vpack.c.bf16 %v53_v3, %v52_v2  ;;  %v55_v5 = vld [vmem:[#allocation2 + $0xc0] sm:$0xff]  ;;  %v57_v8 = vld [vmem:[#allocation2 + $0xd0] sm:$0xff] }
  0xa0   :  { %v175_v12 = vmul.f32 %v1940_v47, %v122_v9  ;;  %v174_v13 = vmul.f32 %v1940_v47, %v117_v10  ;;  %1522 = vmatprep.mubr.f32.mxu0 %v238_v11  ;;  %vm208_vm4 = vcmp.gt.f32.partialorder %v192_v7, 0.0  ;;  %v224_v14 = vmul.f32 0.2, %v192_v7  ;;  %v58_v10 = vld [vmem:[#allocation2 + $0xd8] sm:$0xff]  ;;  %v59_v11 = vld [vmem:[#allocation2 + $0xe0] sm:$0xff] }
  0xa1   :  { %v225_v16 = vmul.f32 0.2, %v193_v6  ;;  %vm209_vm5 = vcmp.gt.f32.partialorder %v193_v6, 0.0  ;;  %1716 = vmatprep.subr.bf16.mxu1 %v1715_v4 }
  0xa2   :  { %v195_v17 = vadd.f32 %v1942_v49, %v175_v12  ;;  %v194_v18 = vadd.f32 %v1942_v49, %v174_v13  ;;  %v240_v19 = vsel %vm208_vm4, %v192_v7, %v224_v14  ;;  %1718 = vmatpush3.bf16.msra.mxu1 %v1715_v4  ;;  %v56_v7 = vld [vmem:[#allocation2 + $0xc8] sm:$0xff]  ;;  %v1727_v12 = vpack.c.bf16 %v59_v11, %v58_v10  ;;  %v61_v14 = vld [vmem:[#allocation2 + $0xf0] sm:$0xff] }
  0xa3   :  { %v132_v20 = vpop.permute.xlu1 %131  ;;  %v127_v21 = vpop.permute.xlu0 %126  ;;  %1523 = vmatmul.mubr.f32.gmra.mrb[2].mxu0 %v239_v15  ;;  %v241_v25 = vsel %vm209_vm5, %v193_v6, %v225_v16  ;;  %v1723_v9 = vpack.c.bf16 %v57_v8, %v56_v7  ;;  %v60_v13 = vld [vmem:[#allocation2 + $0xe8] sm:$0xff]  ;;  %v62_v16 = vld [vmem:[#allocation2 + $0xf8] sm:$0xff] }
  0xa4   :  { %v177_v22 = vmul.f32 %v1940_v47, %v132_v20  ;;  %v176_v23 = vmul.f32 %v1940_v47, %v127_v21  ;;  %1525 = vmatprep.mubr.f32.mxu0 %v240_v19  ;;  %vm210_vm6 = vcmp.gt.f32.partialorder %v194_v18, 0.0  ;;  %v226_v24 = vmul.f32 0.2, %v194_v18  ;;  %v64_v19 = vld [vmem:[#allocation2 + $0x108] sm:$0xff]  ;;  %v65_v20 = vld [vmem:[#allocation2 + $0x110] sm:$0xff] }
  0xa5   :  { %v227_v26 = vmul.f32 0.2, %v195_v17  ;;  %vm211_vm7 = vcmp.gt.f32.partialorder %v195_v17, 0.0  ;;  %v1731_v15 = vpack.c.bf16 %v61_v14, %v60_v13  ;;  %v1860_v21 = vmov 0.0|0.0  }
  0xa6   :  { %v197_v27 = vadd.f32 %v1942_v49, %v177_v22  ;;  %v196_v28 = vadd.f32 %v1942_v49, %v176_v23  ;;  %v242_v29 = vsel %vm210_vm6, %v194_v18, %v226_v24  ;;  %v1977_v22 = vpack.c.bf16 %v65_v20, %v64_v19  ;;  %1751 = vmatprep.subr.bf16.mxu0 %v1860_v21  ;;  %v66_v23 = vld [vmem:[#allocation2 + $0x118] sm:$0xff]  ;;  %v67_v24 = vld [vmem:[#allocation2 + $0x120] sm:$0xff] }
  0xa7   :  { %v142_v30 = vpop.permute.xlu1 %141  ;;  %v137_v31 = vpop.permute.xlu0 %136  ;;  %1526 = vmatmul.mubr.f32.gmra.mrb[4].mxu0 %v241_v25  ;;  %v243_v35 = vsel %vm211_vm7, %v195_v17, %v227_v26  ;;  %v63_v17 = vld [vmem:[#allocation2 + $0x100] sm:$0xff]  ;;  %v1982_v25 = vpack.c.bf16 %v67_v24, %v66_v23  ;;  %v1862_v26 = vmov 0.0  }
  0xa8   :  { %v179_v32 = vmul.f32 %v1940_v47, %v142_v30  ;;  %v178_v33 = vmul.f32 %v1940_v47, %v137_v31  ;;  %1528 = vmatprep.mubr.f32.mxu0 %v242_v29  ;;  %vm212_vm8 = vcmp.gt.f32.partialorder %v196_v28, 0.0  ;;  %v228_v34 = vmul.f32 0.2, %v196_v28  ;;  %1753 = vmatpush3.bf16.msra.mxu0 %v1977_v22  ;;  %v1988_v31 = vld [vmem:[#allocation2 + $0x2] ss:$0 sm:$0xff] }
  0xa9   :  { %v229_v36 = vmul.f32 0.2, %v197_v27  ;;  %vm213_vm9 = vcmp.gt.f32.partialorder %v197_v27, 0.0  ;;  %v1735_v18 = vpack.c.bf16 %v63_v17, %v62_v16  ;;  %1754 = vmatprep.subr.bf16.mxu0 %v1860_v21 }
  0xaa   :  { %v199_v37 = vadd.f32 %v1942_v49, %v179_v32  ;;  %v198_v38 = vadd.f32 %v1942_v49, %v178_v33  ;;  %v244_v39 = vsel %vm212_vm8, %v196_v28, %v228_v34 }
  0xab   :  { %v152_v40 = vpop.permute.xlu1 %151  ;;  %v147_v41 = vpop.permute.xlu0 %146  ;;  %1529 = vmatmul.mubr.f32.gmra.mrb[6].mxu0 %v243_v35  ;;  %v245_v45 = vsel %vm213_vm9, %v197_v27, %v229_v36 }
  0xac   :  { %v181_v42 = vmul.f32 %v1940_v47, %v152_v40  ;;  %v180_v43 = vmul.f32 %v1940_v47, %v147_v41  ;;  %1531 = vmatprep.mubr.f32.mxu0 %v244_v39  ;;  %vm214_vm10 = vcmp.gt.f32.partialorder %v198_v38, 0.0  ;;  %v230_v44 = vmul.f32 0.2, %v198_v38  ;;  %1756 = vmatpush3.bf16.msra.mxu0 %v1982_v25 }
  0xad   :  { %v231_v46 = vmul.f32 0.2, %v199_v37  ;;  %vm215_vm11 = vcmp.gt.f32.partialorder %v199_v37, 0.0  ;;  %1763 = vmatprep.subr.bf16.mxu0 %v1860_v21 }
  0xae   :  { %v201_v48 = vadd.f32 %v1942_v49, %v181_v42  ;;  %v200_v50 = vadd.f32 %v1942_v49, %v180_v43  ;;  %v246_v51 = vsel %vm214_vm10, %v198_v38, %v230_v44 }
  0xaf   :  { %v162_v52 = vpop.permute.xlu1 %161  ;;  %v157_v53 = vpop.permute.xlu0 %156  ;;  %1532 = vmatmul.mubr.f32.gmra.mrb[8].mxu0 %v245_v45  ;;  %v247_v57 = vsel %vm215_vm11, %v199_v37, %v231_v46 }
  0xb0   :  { %v183_v54 = vmul.f32 %v1940_v47, %v162_v52  ;;  %v182_v55 = vmul.f32 %v1940_v47, %v157_v53  ;;  %1534 = vmatprep.mubr.f32.mxu0 %v246_v51  ;;  %vm216_vm12 = vcmp.gt.f32.partialorder %v200_v50, 0.0  ;;  %v232_v56 = vmul.f32 0.2, %v200_v50 }
  0xb1   :  { %v233_v61 = vmul.f32 0.2, %v201_v48  ;;  %vm217_vm13 = vcmp.gt.f32.partialorder %v201_v48, 0.0 }
  0xb2   :  { %v203_v58 = vadd.f32 %v1942_v49, %v183_v54  ;;  %v202_v59 = vadd.f32 %v1942_v49, %v182_v55  ;;  %v248_v60 = vsel %vm216_vm12, %v200_v50, %v232_v56  ;;  %v54_v49 = vld [vmem:[#allocation2 + $0xb8] sm:$0xff] }
  0xb3   :  { %1535 = vmatmul.mubr.f32.gmra.mrb[10].mxu0 %v247_v57  ;;  %v249_v63 = vsel %vm217_vm13, %v201_v48, %v233_v61  ;;  %v1719_v6 = vpack.c.bf16 %v55_v5, %v54_v49 }
  0xb4   :  { %1537 = vmatprep.mubr.f32.mxu0 %v248_v60  ;;  %vm218_vm14 = vcmp.gt.f32.partialorder %v202_v59, 0.0  ;;  %v234_v62 = vmul.f32 0.2, %v202_v59  ;;  %v235_v1 = vmul.f32 0.2, %v203_v58  ;;  %vm219_vm15 = vcmp.gt.f32.partialorder %v203_v58, 0.0 }
  0xb5   :  { %1720 = vmatprep.subr.bf16.mxu1 %v1719_v6 }
  0xb6   :  { %v250_v0 = vsel %vm218_vm14, %v202_v59, %v234_v62  ;;  %v251_v47 = vsel %vm219_vm15, %v203_v58, %v235_v1  ;;  %1722 = vmatpush3.bf16.msra.mxu1 %v1719_v6 }
  0xb7   :  { %1538 = vmatmul.mubr.f32.gmra.mrb[12].mxu0 %v249_v63  ;;  %1724 = vmatprep.subr.bf16.mxu1 %v1723_v9 }
  0xb8   :  { %1540 = vmatprep.mubr.f32.mxu0 %v250_v0 }
  0xba   :  { %1726 = vmatpush3.bf16.msra.mxu1 %v1723_v9 }
  0xbb   :  { %1541 = vmatmul.mubr.f32.gmra.mrb[14].mxu0 %v251_v47  ;;  %1728 = vmatprep.subr.bf16.mxu1 %v1727_v12 }
  0xbc   :  { %1617 = vmatprep.mubr.msk.f32.mxu0 %vm1861_vm0, %v1862_v26 }
  0xbe   :  { %1730 = vmatpush3.bf16.msra.mxu1 %v1727_v12 }
  0xbf   :  { %1732 = vmatprep.subr.bf16.mxu1 %v1731_v15 }
  0xc2   :  { %1734 = vmatpush3.bf16.msra.mxu1 %v1731_v15 }
  0xc3   :  { %1736 = vmatprep.subr.bf16.mxu1 %v1735_v18 }
  0xc6   :  { %1738 = vmatpush3.bf16.msra.mxu1 %v1735_v18 }
  0xc7   :  { %1739 = vmatprep.subr.bf16.mxu1 %v1860_v21 }
 0x172   :  { %v1521_v27 = vpop.f32.mrb[0].mxu0 }
 0x173   :  { %v322_v28 = vpop.f32.mrb[1].mxu0  ;;  %v328_v34 = vadd.f32 %v1521_v27, %v1988_v31 }
 0x174   :  { %v323_v35 = vadd.f32 %v1988_v31, %v322_v28 }
 0x175   :  { %v418_v39 = vmul.f32 0.2, %v328_v34  ;;  %vm402_vm1 = vcmp.gt.f32.partialorder %v328_v34, 0.0 }
 0x176   :  { %v1524_v29 = vpop.f32.mrb[2].mxu0  ;;  %v417_v40 = vmul.f32 0.2, %v323_v35  ;;  %vm401_vm2 = vcmp.gt.f32.partialorder %v323_v35, 0.0 }
 0x177   :  { %v332_v30 = vpop.f32.mrb[3].mxu0  ;;  %v338_v37 = vadd.f32 %v1524_v29, %v1988_v31  ;;  %v434_v52 = vsel %vm402_vm1, %v328_v34, %v418_v39 }
 0x178   :  { %v333_v41 = vadd.f32 %v1988_v31, %v332_v30  ;;  %v433_v51 = vsel %vm401_vm2, %v323_v35, %v417_v40  ;;  %v1380_v40 = vld [vmem:[#allocation2 + $0x3] ss:$0 sm:$0xff]  ;;  %vm566_vm2 = vcmask 261120  }
 0x179   :  { %v420_v43 = vmul.f32 0.2, %v338_v37  ;;  %vm404_vm3 = vcmp.gt.f32.partialorder %v338_v37, 0.0 }
 0x17a   :  { %v1527_v32 = vpop.f32.mrb[4].mxu0  ;;  %v419_v53 = vmul.f32 0.2, %v333_v41  ;;  %vm403_vm6 = vcmp.gt.f32.partialorder %v333_v41, 0.0 }
 0x17b   :  { %v342_v33 = vpop.f32.mrb[5].mxu0  ;;  %v348_v46 = vadd.f32 %v1527_v32, %v1988_v31  ;;  %v436_v60 = vsel %vm404_vm3, %v338_v37, %v420_v43 }
 0x17c   :  { %v343_v54 = vadd.f32 %v1988_v31, %v342_v33  ;;  %v435_v49 = vsel %vm403_vm6, %v333_v41, %v419_v53 }
 0x17d   :  { %vm406_vm7 = vcmp.gt.f32.partialorder %v348_v46, 0.0  ;;  %v422_v0 = vmul.f32 0.2, %v348_v46 }
 0x17e   :  { %v1530_v36 = vpop.f32.mrb[6].mxu0  ;;  %v421_v2 = vmul.f32 0.2, %v343_v54  ;;  %vm405_vm10 = vcmp.gt.f32.partialorder %v343_v54, 0.0 }
 0x17f   :  { %v352_v38 = vpop.f32.mrb[7].mxu0  ;;  %v358_v5 = vadd.f32 %v1530_v36, %v1988_v31  ;;  %v438_v18 = vsel %vm406_vm7, %v348_v46, %v422_v0 }
 0x180   :  { %v353_v9 = vadd.f32 %v1988_v31, %v352_v38  ;;  %v437_v17 = vsel %vm405_vm10, %v343_v54, %v421_v2 }
 0x181   :  { %vm408_vm13 = vcmp.gt.f32.partialorder %v358_v5, 0.0  ;;  %v424_v19 = vmul.f32 0.2, %v358_v5 }
 0x182   :  { %v1533_v42 = vpop.f32.mrb[8].mxu0  ;;  %v423_v27 = vmul.f32 0.2, %v353_v9  ;;  %vm407_vm14 = vcmp.gt.f32.partialorder %v353_v9, 0.0 }
 0x183   :  { %v368_v44 = vadd.f32 %v1533_v42, %v1988_v31  ;;  %v362_v45 = vpop.f32.mrb[9].mxu0  ;;  %v440_v35 = vsel %vm408_vm13, %v358_v5, %v424_v19 }
 0x184   :  { %v363_v48 = vadd.f32 %v1988_v31, %v362_v45  ;;  %v439_v37 = vsel %vm407_vm14, %v353_v9, %v423_v27 }
 0x185   :  { %vm410_vm4 = vcmp.gt.f32.partialorder %v368_v44, 0.0  ;;  %v426_v50 = vmul.f32 0.2, %v368_v44 }
 0x186   :  { %v425_v55 = vmul.f32 0.2, %v363_v48  ;;  %v1536_v56 = vpop.f32.mrb[10].mxu0  ;;  %vm409_vm5 = vcmp.gt.f32.partialorder %v363_v48, 0.0 }
 0x187   :  { %v378_v57 = vadd.f32 %v1536_v56, %v1988_v31  ;;  %v372_v58 = vpop.f32.mrb[11].mxu0  ;;  %v442_v59 = vsel %vm410_vm4, %v368_v44, %v426_v50 }
 0x188   :  { %v373_v61 = vadd.f32 %v1988_v31, %v372_v58  ;;  %v441_v62 = vsel %vm409_vm5, %v363_v48, %v425_v55  ;;  %v450_v63 = vmax.f32 %v434_v52, %v442_v59  ;;  %v2036_v59 = vld [vmem:[#allocation2 + $0x6] ss:$0 sm:$0xff] }
 0x189   :  { %vm412_vm8 = vcmp.gt.f32.partialorder %v378_v57, 0.0  ;;  %v428_v1 = vmul.f32 0.2, %v378_v57  ;;  %v449_v47 = vmax.f32 %v433_v51, %v441_v62 }
 0x18a   :  { %vm411_vm9 = vcmp.gt.f32.partialorder %v373_v61, 0.0  ;;  %v427_v3 = vmul.f32 0.2, %v373_v61  ;;  %v1539_v4 = vpop.f32.mrb[12].mxu0 }
 0x18b   :  { %v388_v6 = vadd.f32 %v1539_v4, %v1988_v31  ;;  %v382_v7 = vpop.f32.mrb[13].mxu0  ;;  %1575 = vmatprep.mubr.f32.mxu1 %v449_v47  ;;  %v444_v8 = vsel %vm412_vm8, %v378_v57, %v428_v1 }
 0x18c   :  { %v383_v10 = vadd.f32 %v1988_v31, %v382_v7  ;;  %1576 = vmatmul.mubr.f32.vlgmr.msra.gmra.mrb[0].mxu1 %v450_v63  ;;  %v443_v11 = vsel %vm411_vm9, %v373_v61, %v427_v3  ;;  %v452_v12 = vmax.f32 %v436_v60, %v444_v8 }
 0x18d   :  { %vm414_vm11 = vcmp.gt.f32.partialorder %v388_v6, 0.0  ;;  %v430_v13 = vmul.f32 0.2, %v388_v6  ;;  %1741 = vmatpush3.bf16.msra.mxu1 %v1977_v22  ;;  %v451_v14 = vmax.f32 %v435_v49, %v443_v11 }
 0x18e   :  { %vm413_vm12 = vcmp.gt.f32.partialorder %v383_v10, 0.0  ;;  %v429_v15 = vmul.f32 0.2, %v383_v10  ;;  %v1542_v16 = vpop.f32.mrb[14].mxu0  ;;  %1742 = vmatprep.subr.bf16.mxu1 %v1860_v21 }
 0x18f   :  { %v398_v20 = vadd.f32 %v1542_v16, %v1988_v31  ;;  %v392_v23 = vpop.f32.mrb[15].mxu0  ;;  %1578 = vmatprep.mubr.f32.mxu1 %v451_v14  ;;  %v446_v24 = vsel %vm414_vm11, %v388_v6, %v430_v13 }
 0x190   :  { %v393_v28 = vadd.f32 %v1988_v31, %v392_v23  ;;  %1579 = vmatmul.mubr.f32.gmra.mrb[2].mxu1 %v452_v12  ;;  %v445_v29 = vsel %vm413_vm12, %v383_v10, %v429_v15  ;;  %v454_v30 = vmax.f32 %v438_v18, %v446_v24 }
 0x191   :  { %vm416_vm15 = vcmp.gt.f32.partialorder %v398_v20, 0.0  ;;  %v432_v32 = vmul.f32 0.2, %v398_v20  ;;  %v453_v33 = vmax.f32 %v437_v17, %v445_v29  ;;  %1744 = vmatpush3.bf16.msra.mxu1 %v1982_v25 }
 0x192   :  { %vm415_vm1 = vcmp.gt.f32.partialorder %v393_v28, 0.0  ;;  %v431_v34 = vmul.f32 0.2, %v393_v28  ;;  %1745 = vmatprep.subr.bf16.mxu1 %v1860_v21 }
 0x193   :  { %1581 = vmatprep.mubr.f32.mxu1 %v453_v33  ;;  %v448_v36 = vsel %vm416_vm15, %v398_v20, %v432_v32 }
 0x194   :  { %1582 = vmatmul.mubr.f32.gmra.mrb[4].mxu1 %v454_v30  ;;  %v447_v31 = vsel %vm415_vm1, %v393_v28, %v431_v34  ;;  %v456_v38 = vmax.f32 %v440_v35, %v448_v36 }
 0x195   :  { %v455_v39 = vmax.f32 %v439_v37, %v447_v31 }
 0x197   :  { %1584 = vmatprep.mubr.f32.mxu1 %v455_v39 }
 0x198   :  { %1585 = vmatmul.mubr.f32.gmra.mrb[6].mxu1 %v456_v38 }
 0x199   :  { %1595 = vmatprep.mubr.msk.f32.mxu1 %vm1861_vm0, %v1862_v26 }
 0x19c   :  { %1596 = vmatmul.mubr.f32.vlgmr.msra.gmra.mrb[8].mxu1 %v1862_v26 }
 0x19d   :  { %1747 = vmatpush3.bf16.msra.mxu1 %v1977_v22  ;;  %1606 = vmatprep.mubr.msk.f32.mxu1 %vm1861_vm0, %v1862_v26 }
 0x19e   :  { %1748 = vmatprep.subr.bf16.mxu1 %v1860_v21 }
 0x1a1   :  { %1750 = vmatpush3.bf16.msra.mxu1 %v1982_v25 }
 0x1a2   :  { %1757 = vmatprep.subr.bf16.mxu1 %v1860_v21 }
 0x25f   :  { %v1577_v41 = vpop.f32.mrb[0].mxu1 }
 0x260   :  { %v533_v42 = vadd.f32 %v1577_v41, %v1380_v40  ;;  %v527_v43 = vpop.f32.mrb[1].mxu1 }
 0x261   :  { %v528_v58 = vadd.f32 %v1380_v40, %v527_v43 }
 0x263   :  { %v1580_v44 = vpop.f32.mrb[2].mxu1 }
 0x264   :  { %v2024_v45 = vadd.f32 %v1580_v44, %v1380_v40  ;;  %v537_v46 = vpop.f32.mrb[3].mxu1 }
 0x265   :  { %v2026_v48 = vadd.f32 %v1380_v40, %v537_v46 }
 0x267   :  { %v1583_v50 = vpop.f32.mrb[4].mxu1 }
 0x268   :  { %v2028_v51 = vadd.f32 %v1583_v50, %v1380_v40  ;;  %v547_v52 = vpop.f32.mrb[5].mxu1 }
 0x269   :  { %v2030_v53 = vadd.f32 %v1380_v40, %v547_v52 }
 0x26b   :  { %v1586_v54 = vpop.f32.mrb[6].mxu1 }
 0x26c   :  { %v2032_v55 = vadd.f32 %v1586_v54, %v1380_v40  ;;  %v557_v56 = vpop.f32.mrb[7].mxu1 }
 0x26d   :  { %v2034_v57 = vadd.f32 %v1380_v40, %v557_v56 }
 0x26f   :  { %v636_v60 = vpop.f32.mrb[8].mxu1 }
 0x270   :  { %v640_v61 = vadd.f32 %v636_v60, %v528_v58  ;;  %v1597_v62 = vpop.f32.mrb[9].mxu1 }
 0x272   :  { %v645_v63 = vmul.f32 %v2036_v59, %v640_v61 }
 0x274   :  { %1798 = vtanh.f32 %v645_v63 }
 0x27e   :  { %v1799_v0 = vpop.eup %1798 }
 0x27f   :  { %651 = vrot.lane.b32.xlu0 %v1799_v0, %s1863_s0  ;;  %v647_v1 = vmul.f32 0.5, %v1799_v0 }
 0x281   :  { %v648_v47 = vadd.f32 0.5, %v647_v1 }
 0x283   :  { %v649_v4 = vmul.f32 0.0, %v648_v47 }
 0x2f1   :  { %v652_v2 = vpop.permute.xlu0 %651 }
 0x2f2   :  { %v654_v3 = vmul.f32 %v652_v2, %v648_v47 }
 0x2f4   :  { %656 = vrot.lane.b32.xlu1 %v654_v3, %s1863_s0 }
 0x366   :  { %v657_v49 = vpop.permute.xlu1 %656 }
 0x367   :  { %v659_v5 = vadd.f32 %v657_v49, %v649_v4 }
 0x369   :  { %1800 = vtanh.f32 %v659_v5 }
 0x373   :  { %v1801_v6 = vpop.eup %1800 }
 0x374   :  { %662 = vrot.lane.b32.xlu0 %v1801_v6, %s1863_s0 }
 0x3e6   :  { %v663_v7 = vpop.permute.xlu0 %662 }
 0x3e7   :  { %v665_v8 = vmul.f32 %v663_v7, %v648_v47 }
 0x3e9   :  { %667 = vrot.lane.b32.xlu1 %v665_v8, %s1864_s26 }
 0x45b   :  { %v668_v9 = vpop.permute.xlu1 %667 }
 0x45c   :  { %1607 = vmatmul.mubr.msk.f32.vlgmr.msra.gmra.mrb[10].mxu1 %vm566_vm2, %v668_v9 }
 0x45d   :  { %1759 = vmatpush3.bf16.msra.mxu1 %v1977_v22  ;;  %1628 = vmatprep.mubr.msk.f32.mxu1 %vm1861_vm0, %v1862_v26 }
 0x45e   :  { %1760 = vmatprep.subr.bf16.mxu1 %v1860_v21 }
 0x461   :  { %1762 = vmatpush3.bf16.msra.mxu1 %v1982_v25 }
 0x462   :  { %1769 = vmatprep.subr.bf16.mxu1 %v1860_v21 }
 0x52f   :  { %v737_v10 = vpop.f32.mrb[10].mxu1 }
 0x530   :  { %v741_v11 = vadd.f32 %v737_v10, %v533_v42  ;;  %v1608_v12 = vpop.f32.mrb[11].mxu1 }
 0x532   :  { %v742_v13 = vmul.f32 %v2036_v59, %v741_v11 }
 0x534   :  { %1802 = vtanh.f32 %v742_v13 }
 0x53e   :  { %v1803_v14 = vpop.eup %1802 }
 0x53f   :  { %748 = vrot.lane.b32.xlu0 %v1803_v14, %s1863_s0  ;;  %v744_v15 = vmul.f32 0.5, %v1803_v14 }
 0x541   :  { %v745_v16 = vadd.f32 0.5, %v744_v15 }
 0x543   :  { %v746_v19 = vmul.f32 %v745_v16, %v659_v5 }
 0x5b1   :  { %v749_v17 = vpop.permute.xlu0 %748 }
 0x5b2   :  { %v751_v18 = vmul.f32 %v749_v17, %v745_v16 }
 0x5b4   :  { %753 = vrot.lane.b32.xlu1 %v751_v18, %s1863_s0 }
 0x626   :  { %v754_v20 = vpop.permute.xlu1 %753 }
 0x627   :  { %v756_v23 = vadd.f32 %v754_v20, %v746_v19 }
 0x629   :  { %1804 = vtanh.f32 %v756_v23 }
 0x633   :  { %v1805_v24 = vpop.eup %1804 }
 0x634   :  { %759 = vrot.lane.b32.xlu0 %v1805_v24, %s1863_s0 }
 0x6a6   :  { %v760_v27 = vpop.permute.xlu0 %759 }
 0x6a7   :  { %v762_v28 = vmul.f32 %v760_v27, %v745_v16 }
 0x6a9   :  { %764 = vrot.lane.b32.xlu1 %v762_v28, %s1864_s26 }
 0x71b   :  { %v765_v29 = vpop.permute.xlu1 %764 }
 0x71c   :  { %1618 = vmatmul.mubr.msk.f32.vlgmr.msra.gmra.mrb[16].mxu0 %vm566_vm2, %v765_v29 }
 0x71d   :  { %1765 = vmatpush3.bf16.msra.mxu0 %v1977_v22  ;;  %1639 = vmatprep.mubr.msk.f32.mxu0 %vm1861_vm0, %v1862_v26 }
 0x71e   :  { %1766 = vmatprep.subr.bf16.mxu0 %v1860_v21 }
 0x721   :  { %1768 = vmatpush3.bf16.msra.mxu0 %v1982_v25 }
 0x722   :  { %1775 = vmatprep.subr.bf16.mxu0 %v1860_v21 }
 0x7ef   :  { %v834_v30 = vpop.f32.mrb[16].mxu0 }
 0x7f0   :  { %v838_v32 = vadd.f32 %v834_v30, %v2026_v48  ;;  %v1619_v33 = vpop.f32.mrb[17].mxu0 }
 0x7f2   :  { %v839_v34 = vmul.f32 %v2036_v59, %v838_v32 }
 0x7f4   :  { %1806 = vtanh.f32 %v839_v34 }
 0x7fe   :  { %v1807_v35 = vpop.eup %1806 }
 0x7ff   :  { %845 = vrot.lane.b32.xlu0 %v1807_v35, %s1863_s0  ;;  %v841_v36 = vmul.f32 0.5, %v1807_v35 }
 0x801   :  { %v842_v37 = vadd.f32 0.5, %v841_v36 }
 0x803   :  { %v843_v39 = vmul.f32 %v842_v37, %v756_v23 }
 0x871   :  { %v846_v31 = vpop.permute.xlu0 %845 }
 0x872   :  { %v848_v38 = vmul.f32 %v846_v31, %v842_v37 }
 0x874   :  { %850 = vrot.lane.b32.xlu1 %v848_v38, %s1863_s0 }
 0x8e6   :  { %v851_v40 = vpop.permute.xlu1 %850 }
 0x8e7   :  { %v853_v41 = vadd.f32 %v851_v40, %v843_v39 }
 0x8e9   :  { %1808 = vtanh.f32 %v853_v41 }
 0x8f3   :  { %v1809_v42 = vpop.eup %1808 }
 0x8f4   :  { %856 = vrot.lane.b32.xlu0 %v1809_v42, %s1863_s0 }
 0x966   :  { %v857_v43 = vpop.permute.xlu0 %856 }
 0x967   :  { %v859_v44 = vmul.f32 %v857_v43, %v842_v37 }
 0x969   :  { %861 = vrot.lane.b32.xlu1 %v859_v44, %s1864_s26 }
 0x9db   :  { %v862_v46 = vpop.permute.xlu1 %861 }
 0x9dc   :  { %1629 = vmatmul.mubr.msk.f32.vlgmr.msra.gmra.mrb[12].mxu1 %vm566_vm2, %v862_v46 }
 0x9dd   :  { %1771 = vmatpush3.bf16.msra.mxu1 %v1977_v22  ;;  %1650 = vmatprep.mubr.msk.f32.mxu1 %vm1861_vm0, %v1862_v26 }
 0x9de   :  { %1772 = vmatprep.subr.bf16.mxu1 %v1860_v21 }
 0x9e1   :  { %1774 = vmatpush3.bf16.msra.mxu1 %v1982_v25 }
 0x9e2   :  { %1781 = vmatprep.subr.bf16.mxu1 %v1860_v21 }
 0xaaf   :  { %v931_v48 = vpop.f32.mrb[12].mxu1 }
 0xab0   :  { %v935_v50 = vadd.f32 %v931_v48, %v2024_v45  ;;  %v1630_v52 = vpop.f32.mrb[13].mxu1 }
 0xab2   :  { %v936_v54 = vmul.f32 %v2036_v59, %v935_v50 }
 0xab4   :  { %1810 = vtanh.f32 %v936_v54 }
 0xabe   :  { %v1811_v56 = vpop.eup %1810 }
 0xabf   :  { %942 = vrot.lane.b32.xlu0 %v1811_v56, %s1863_s0  ;;  %v938_v58 = vmul.f32 0.5, %v1811_v56 }
 0xac1   :  { %v939_v60 = vadd.f32 0.5, %v938_v58 }
 0xac3   :  { %v940_v63 = vmul.f32 %v939_v60, %v853_v41 }
 0xb31   :  { %v943_v61 = vpop.permute.xlu0 %942 }
 0xb32   :  { %v945_v62 = vmul.f32 %v943_v61, %v939_v60 }
 0xb34   :  { %947 = vrot.lane.b32.xlu1 %v945_v62, %s1863_s0 }
 0xba6   :  { %v948_v0 = vpop.permute.xlu1 %947 }
 0xba7   :  { %v950_v1 = vadd.f32 %v948_v0, %v940_v63 }
 0xba9   :  { %1812 = vtanh.f32 %v950_v1 }
 0xbb3   :  { %v1813_v47 = vpop.eup %1812 }
 0xbb4   :  { %953 = vrot.lane.b32.xlu0 %v1813_v47, %s1863_s0 }
 0xc26   :  { %v954_v45 = vpop.permute.xlu0 %953 }
 0xc27   :  { %v956_v2 = vmul.f32 %v954_v45, %v939_v60 }
 0xc29   :  { %958 = vrot.lane.b32.xlu1 %v956_v2, %s1864_s26 }
 0xc9b   :  { %v959_v3 = vpop.permute.xlu1 %958 }
 0xc9c   :  { %1640 = vmatmul.mubr.msk.f32.vlgmr.msra.gmra.mrb[18].mxu0 %vm566_vm2, %v959_v3 }
 0xc9d   :  { %1777 = vmatpush3.bf16.msra.mxu0 %v1977_v22  ;;  %1661 = vmatprep.mubr.msk.f32.mxu0 %vm1861_vm0, %v1862_v26 }
 0xc9e   :  { %1778 = vmatprep.subr.bf16.mxu0 %v1860_v21 }
 0xca1   :  { %1780 = vmatpush3.bf16.msra.mxu0 %v1982_v25 }
 0xd6f   :  { %v1028_v4 = vpop.f32.mrb[18].mxu0 }
 0xd70   :  { %v1032_v49 = vadd.f32 %v1028_v4, %v2030_v53  ;;  %v1641_v5 = vpop.f32.mrb[19].mxu0 }
 0xd72   :  { %v1033_v6 = vmul.f32 %v2036_v59, %v1032_v49 }
 0xd74   :  { %1814 = vtanh.f32 %v1033_v6 }
 0xd7e   :  { %v1815_v7 = vpop.eup %1814 }
 0xd7f   :  { %1039 = vrot.lane.b32.xlu0 %v1815_v7, %s1863_s0  ;;  %v1035_v8 = vmul.f32 0.5, %v1815_v7  ;;  %v1390_v7 = vld [vmem:[#allocation2 + $0x5] ss:$0 sm:$0xff] }
 0xd81   :  { %v1036_v9 = vadd.f32 0.5, %v1035_v8 }
 0xd83   :  { %v1037_v12 = vmul.f32 %v1036_v9, %v950_v1  ;;  %v1389_v1 = vld [vmem:[#allocation2 + $0x4] ss:$0 sm:$0xff] }
 0xdf1   :  { %v1040_v10 = vpop.permute.xlu0 %1039 }
 0xdf2   :  { %v1042_v11 = vmul.f32 %v1040_v10, %v1036_v9 }
 0xdf4   :  { %1044 = vrot.lane.b32.xlu1 %v1042_v11, %s1863_s0 }
 0xe66   :  { %v1045_v13 = vpop.permute.xlu1 %1044 }
 0xe67   :  { %v1047_v14 = vadd.f32 %v1045_v13, %v1037_v12 }
 0xe69   :  { %1816 = vtanh.f32 %v1047_v14 }
 0xe73   :  { %v1817_v15 = vpop.eup %1816 }
 0xe74   :  { %1050 = vrot.lane.b32.xlu0 %v1817_v15, %s1863_s0 }
 0xee6   :  { %v1051_v53 = vpop.permute.xlu0 %1050 }
 0xee7   :  { %v1053_v16 = vmul.f32 %v1051_v53, %v1036_v9 }
 0xee9   :  { %1055 = vrot.lane.b32.xlu1 %v1053_v16, %s1864_s26 }
 0xf5b   :  { %v1056_v17 = vpop.permute.xlu1 %1055 }
 0xf5c   :  { %1651 = vmatmul.mubr.msk.f32.vlgmr.msra.gmra.mrb[14].mxu1 %vm566_vm2, %v1056_v17 }
 0xf5d   :  { %1783 = vmatpush3.bf16.msra.mxu1 %v1977_v22  ;;  %1672 = vmatprep.mubr.msk.f32.mxu1 %vm1861_vm0, %v1862_v26  ;;  %vm1370_vm0 = vcmask 7168  }
 0xf5e   :  { %1784 = vmatprep.subr.bf16.mxu1 %v1860_v21 }
 0xf61   :  { %1786 = vmatpush3.bf16.msra.mxu1 %v1982_v25 }
0x102f   :  { %v1125_v18 = vpop.f32.mrb[14].mxu1 }
0x1030   :  { %v1129_v19 = vadd.f32 %v1125_v18, %v2028_v51  ;;  %v1652_v20 = vpop.f32.mrb[15].mxu1 }
0x1032   :  { %v1130_v23 = vmul.f32 %v2036_v59, %v1129_v19 }
0x1034   :  { %1818 = vtanh.f32 %v1130_v23 }
0x103e   :  { %v1819_v24 = vpop.eup %1818 }
0x103f   :  { %1136 = vrot.lane.b32.xlu0 %v1819_v24, %s1863_s0  ;;  %v1132_v27 = vmul.f32 0.5, %v1819_v24 }
0x1041   :  { %v1133_v28 = vadd.f32 0.5, %v1132_v27 }
0x1043   :  { %v1134_v26 = vmul.f32 %v1133_v28, %v1047_v14 }
0x10b1   :  { %v1137_v22 = vpop.permute.xlu0 %1136 }
0x10b2   :  { %v1139_v29 = vmul.f32 %v1137_v22, %v1133_v28 }
0x10b4   :  { %1141 = vrot.lane.b32.xlu1 %v1139_v29, %s1863_s0 }
0x1126   :  { %v1142_v21 = vpop.permute.xlu1 %1141 }
0x1127   :  { %v1144_v30 = vadd.f32 %v1142_v21, %v1134_v26 }
0x1129   :  { %1820 = vtanh.f32 %v1144_v30 }
0x1133   :  { %v1821_v25 = vpop.eup %1820 }
0x1134   :  { %1147 = vrot.lane.b32.xlu0 %v1821_v25, %s1863_s0 }
0x11a6   :  { %v1148_v51 = vpop.permute.xlu0 %1147 }
0x11a7   :  { %v1150_v32 = vmul.f32 %v1148_v51, %v1133_v28 }
0x11a9   :  { %1152 = vrot.lane.b32.xlu1 %v1150_v32, %s1864_s26 }
0x121b   :  { %v1153_v33 = vpop.permute.xlu1 %1152 }
0x121c   :  { %1662 = vmatmul.mubr.msk.f32.vlgmr.msra.gmra.mrb[20].mxu0 %vm566_vm2, %v1153_v33 }
0x12ef   :  { %v1222_v34 = vpop.f32.mrb[20].mxu0 }
0x12f0   :  { %v1226_v35 = vadd.f32 %v1222_v34, %v2034_v57  ;;  %v1663_v36 = vpop.f32.mrb[21].mxu0 }
0x12f2   :  { %v1227_v37 = vmul.f32 %v2036_v59, %v1226_v35 }
0x12f4   :  { %1822 = vtanh.f32 %v1227_v37 }
0x12fe   :  { %v1823_v31 = vpop.eup %1822 }
0x12ff   :  { %1233 = vrot.lane.b32.xlu0 %v1823_v31, %s1863_s0  ;;  %v1229_v38 = vmul.f32 0.5, %v1823_v31 }
0x1301   :  { %v1230_v39 = vadd.f32 0.5, %v1229_v38 }
0x1303   :  { %v1231_v42 = vmul.f32 %v1230_v39, %v1144_v30 }
0x1371   :  { %v1234_v40 = vpop.permute.xlu0 %1233 }
0x1372   :  { %v1236_v41 = vmul.f32 %v1234_v40, %v1230_v39 }
0x1374   :  { %1238 = vrot.lane.b32.xlu1 %v1236_v41, %s1863_s0 }
0x13e6   :  { %v1239_v43 = vpop.permute.xlu1 %1238 }
0x13e7   :  { %v1241_v44 = vadd.f32 %v1239_v43, %v1231_v42 }
0x13e9   :  { %1824 = vtanh.f32 %v1241_v44 }
0x13f3   :  { %v1825_v46 = vpop.eup %1824 }
0x13f4   :  { %1244 = vrot.lane.b32.xlu0 %v1825_v46, %s1863_s0 }
0x1466   :  { %v1245_v57 = vpop.permute.xlu0 %1244 }
0x1467   :  { %v1247_v48 = vmul.f32 %v1245_v57, %v1230_v39 }
0x1469   :  { %1249 = vrot.lane.b32.xlu1 %v1247_v48, %s1864_s26 }
0x14db   :  { %v1250_v50 = vpop.permute.xlu1 %1249 }
0x14dc   :  { %1673 = vmatmul.mubr.msk.f32.vlgmr.msra.gmra.mrb[16].mxu1 %vm566_vm2, %v1250_v50 }
0x15af   :  { %v1319_v52 = vpop.f32.mrb[16].mxu1 }
0x15b0   :  { %v1323_v54 = vadd.f32 %v1319_v52, %v2032_v55  ;;  %v1674_v56 = vpop.f32.mrb[17].mxu1 }
0x15b2   :  { %v1324_v58 = vmul.f32 %v2036_v59, %v1323_v54 }
0x15b4   :  { %1826 = vtanh.f32 %v1324_v58 }
0x15be   :  { %v1827_v60 = vpop.eup %1826 }
0x15bf   :  { %1330 = vrot.lane.b32.xlu0 %v1827_v60, %s1863_s0  ;;  %v1326_v61 = vmul.f32 0.5, %v1827_v60 }
0x15c1   :  { %v1327_v62 = vadd.f32 0.5, %v1326_v61 }
0x15c3   :  { %v1328_v47 = vmul.f32 %v1327_v62, %v1241_v44 }
0x1631   :  { %v1331_v63 = vpop.permute.xlu0 %1330 }
0x1632   :  { %v1333_v0 = vmul.f32 %v1331_v63, %v1327_v62 }
0x1634   :  { %1335 = vrot.lane.b32.xlu1 %v1333_v0, %s1863_s0 }
0x1638   :  { %1350 = vrot.lane.b32.xlu1 %v1389_v1, %s1864_s26 }
0x16a6   :  { %v1336_v45 = vpop.permute.xlu1 %1335 }
0x16a7   :  { %v1338_v2 = vadd.f32 %v1336_v45, %v1328_v47 }
0x16a9   :  { %1828 = vtanh.f32 %v1338_v2 }
0x16aa   :  { %v1351_v3 = vpop.permute.xlu1 %1350 }
0x16b3   :  { %v1829_v55 = vpop.eup %1828 }
0x16b4   :  { %1341 = vrot.lane.b32.xlu0 %v1829_v55, %s1863_s0 }
0x1726   :  { %v1342_v59 = vpop.permute.xlu0 %1341 }
0x1727   :  { %v1344_v4 = vmul.f32 %v1342_v59, %v1327_v62 }
0x1729   :  { %v1353_v49 = vmul.f32 %v1351_v3, %v1344_v4 }
0x172b   :  { %1355 = vrot.lane.b32.xlu0 %v1353_v49, %s1864_s26 }
0x179d   :  { %v1356_v5 = vpop.permute.xlu0 %1355 }
0x179e   :  { %v1358_v6 = vsel %vm566_vm2, %v1356_v5, 0.0 }
0x179f   :  { %1359 = vadd.xlane.f32.xlu1 %v1358_v6 }
0x182c   :  { %v1360_v8 = vpop.xlane.xlu1 %1359 }
0x182d   :  { %v1365_v9 = vadd.f32 %v1390_v7, %v1360_v8 }
0x182f   :  { %v1366_v10 = vmul.f32 0.5, %v1365_v9 }
0x1831   :  { %1830 = vtanh.f32 %v1366_v10 }
0x183b   :  { %v1831_v11 = vpop.eup %1830 }
0x183c   :  { %v1368_v12 = vmul.f32 0.5, %v1831_v11 }
0x183e   :  { %v1369_v13 = vadd.f32 0.5, %v1368_v12 }
0x1840   :  { %1371 = vst.msk [vmem:[%s2126_s2] sm:$0xff] %vm1370_vm0, %v1369_v13 }
0x1841   :  { %1376 = vsyncpa [#allocation3], 1 }

</bundles_post_ra>
